<compile_context>
chip_gen: v7x
topology: tpu7x:2x2x1
jax: 0.10.0
libtpu: 0.0.40
codegen_flags: <defaults>
</compile_context>

<pallas_src>
import functools

import numpy as np
import jax
import jax.numpy as jnp
from jax.experimental import pallas as pl
from jax.experimental.pallas import tpu as pltpu


def make_kernel(k):
    """Same as the PyTorch make_kernel: 1-D -> outer product, then normalize."""
    k = np.asarray(k, dtype=np.float32)
    if k.ndim == 1:
        k = k[None, :] * k[:, None]
    k = k / k.sum()
    return k


def _round_up(x, m):
    return (x + m - 1) // m * m


def _cdiv(a, b):
    return -(-a // b)


# -----------------------------------------------------------------------------
# Kernels.  Channels-last blocks: channels on lanes, W on sublanes, H/phase major.
# -----------------------------------------------------------------------------
def _downsample_sep_kernel(ph_ref, o_ref, *, kvf, khf, d, out_h, out_w):
    """Separable FIR + decimate.  ph_ref: (d*d, Hph, Wph, tb), o_ref: (out_h, out_w, tb)."""
    wph = ph_ref.shape[2]
    tb = ph_ref.shape[3]
    acc0 = jnp.zeros(o_ref.shape, jnp.float32)
    acc1 = jnp.zeros(o_ref.shape, jnp.float32)
    for pj in range(d):
        # Pass 1: vertical blur for column-phase pj.  Row offsets (ai) are on a
        # major dim -> pure addressing, no relayout copies.
        a0 = jnp.zeros((out_h, wph, tb), jnp.float32)
        a1 = jnp.zeros((out_h, wph, tb), jnp.float32)
        for i, wv in enumerate(kvf):
            if wv == 0.0:
                continue
            pi, ai = i % d, i // d
            tap = ph_ref[pi * d + pj, pl.ds(ai, out_h), :, :].astype(jnp.float32)
            if i % 2 == 0:
                a0 = a0 + wv * tap
            else:
                a1 = a1 + wv * tap
        hblur = a0 + a1
        # Pass 2: horizontal blur, consumed immediately (no extra VMEM scratch).
        # The sublane offset aj is a static slice of an in-register value.
        for j, wh in enumerate(khf):
            if wh == 0.0 or (j % d) != pj:
                continue
            aj = j // d
            tap = hblur[:, aj:aj + out_w, :]
            if aj % 2 == 0:
                acc0 = acc0 + wh * tap
            else:
                acc1 = acc1 + wh * tap
    o_ref[...] = (acc0 + acc1).astype(o_ref.dtype)


def _downsample_2d_kernel(ph_ref, o_ref, *, taps, out_h, out_w):
    """Direct (non-separable) FIR taps; same block layout as the separable kernel."""
    acc0 = jnp.zeros(o_ref.shape, jnp.float32)
    acc1 = jnp.zeros(o_ref.shape, jnp.float32)
    for t, (pidx, ai, aj, w) in enumerate(taps):
        tap = ph_ref[pidx, pl.ds(ai, out_h), pl.ds(aj, out_w), :].astype(jnp.float32)
        if t % 2 == 0:
            acc0 = acc0 + w * tap
        else:
            acc1 = acc1 + w * tap
    o_ref[...] = (acc0 + acc1).astype(o_ref.dtype)


# -----------------------------------------------------------------------------
# Wrapper
# -----------------------------------------------------------------------------
def downsample(x, kernel, factor=2):
    """y = upfirdn2d(x, make_kernel(kernel), up=1, down=factor, pad=(pad0, pad1)).

    x      : (N, C, H, W)
    kernel : 1-D (separable fast path) or 2-D FIR kernel.
    """
    k_in = np.asarray(kernel, dtype=np.float32)
    separable = k_in.ndim == 1
    k2d = make_kernel(k_in)
    kh, kw = k2d.shape
    d = int(factor)
    p = kh - d
    pad0 = (p + 1) // 2
    pad1 = p // 2

    N, C, H, W = x.shape
    NC = N * C
    Hp = H + pad0 + pad1
    Wp = W + pad0 + pad1
    out_h = (Hp - kh) // d + 1
    out_w = (Wp - kw) // d + 1
    # Polyphase plane extents: unit-stride tap offsets inside the kernel.
    Hph = out_h + (kh - 1) // d
    Wph = out_w + (kw - 1) // d

    # ---------------- VMEM-budgeted channel-block (tb) selection ----------------
    itemsize = jnp.dtype(x.dtype).itemsize
    sub = 8 * 4 // itemsize          # sublane tile rows: f32 -> 8, bf16 -> 16

    def footprint(tb):
        """Tile-padded VMEM bytes for one grid step (double-buffered in/out + temps)."""
        tb_l = _round_up(tb, 128)
        in_blk = d * d * Hph * _round_up(Wph, sub) * tb_l * itemsize
        out_blk = out_h * _round_up(out_w, sub) * tb_l * itemsize
        tmp = 2 * out_h * (_round_up(out_w, 8) + _round_up(Wph, 8)) * tb_l * 4
        return 2 * in_blk + 2 * out_blk + tmp

    try:
        vmem_cap = int(pltpu.get_tpu_info().vmem_capacity_bytes)
    except Exception:
        vmem_cap = 64 * 1024 * 1024        # v7x per-TC VMEM (most restrictive)
    vmem_limit = min(int(vmem_cap * 0.85), 100 * 1024 * 1024)
    budget = min(int(vmem_limit * 0.75), 48 * 1024 * 1024)

    if NC <= 128:
        tb = NC
        while tb > 1 and footprint(tb) > budget:
            tb = (tb + 1) // 2
    else:
        # Largest multiple of 128 under the budget, keeping >= ~4 grid steps.
        cap = min(_round_up(NC, 128), max(128, _round_up(_cdiv(NC, 4), 128)))
        tb = 128
        while tb + 128 <= cap and footprint(tb + 128) <= budget:
            tb += 128
        while tb > 8 and footprint(tb) > budget:
            tb //= 2
    # TODO(synk): for very large spatial maps (>=2K) even a single-channel block
    # can exceed the budget; add an out_h grid axis with a (kh-1)//d-row halo.

    nb = _cdiv(NC, tb)
    # Prefer an even step count: the ("parallel",) grid is sharded over v7x's 2 TCs.
    if nb > 1 and nb % 2 == 1:
        gran = 128 if NC > 128 else 1
        tb_even = max(gran, _round_up(_cdiv(NC, nb + 1), gran))
        if tb_even < tb and _cdiv(NC, tb_even) % 2 == 0:
            tb = tb_even
            nb = _cdiv(NC, tb)
    NCp = nb * tb

    # ---------------- single wrapper pre-pass ----------------
    # NCHW -> channels-last is needed by the kernel anyway; fuse the zero-padding
    # and the stride-d polyphase split into the same pass and emit contiguous
    # per-block HBM ranges (nb, d*d, Hph, Wph, tb).
    extra_h = max(0, Hph * d - Hp)
    extra_w = max(0, Wph * d - Wp)
    xt = jnp.transpose(x.reshape(NC, H, W), (1, 2, 0))            # (H, W, NC)
    xp = jnp.pad(xt, ((pad0, pad1 + extra_h), (pad0, pad1 + extra_w), (0, NCp - NC)))
    phases = jnp.stack(
        [xp[pi::d, pj::d, :][:Hph, :Wph, :] for pi in range(d) for pj in range(d)],
        axis=0,
    )                                                             # (d*d, Hph, Wph, NCp)
    phases = phases.reshape(d * d, Hph, Wph, nb, tb).transpose(3, 0, 1, 2, 4)

    # ---------------- compile-time tap weights ----------------
    if separable:
        k1 = k_in / k_in.sum()
        kvf = tuple(float(v) for v in k1[::-1])   # flipped 1-D == true convolution
        khf = kvf
        kern = functools.partial(_downsample_sep_kernel, kvf=kvf, khf=khf,
                                 d=d, out_h=out_h, out_w=out_w)
    else:
        kflip = k2d[::-1, ::-1]
        taps = tuple(
            ((i % d) * d + (j % d), i // d, j // d, float(kflip[i, j]))
            for i in range(kh) for j in range(kw) if float(kflip[i, j]) != 0.0
        )
        kern = functools.partial(_downsample_2d_kernel, taps=taps,
                                 out_h=out_h, out_w=out_w)

    cost = pl.CostEstimate(
        flops=2 * kh * kw * out_h * out_w * NCp,
        transcendentals=0,
        bytes_accessed=int(phases.size) * itemsize + NCp * out_h * out_w * itemsize,
    )

    out_blocks = pl.pallas_call(
        kern,
        out_shape=jax.ShapeDtypeStruct((nb, out_h, out_w, tb), x.dtype),
        grid_spec=pltpu.PrefetchScalarGridSpec(
            num_scalar_prefetch=0,
            grid=(nb,),
            in_specs=[pl.BlockSpec((None, d * d, Hph, Wph, tb),
                                   lambda i: (i, 0, 0, 0, 0))],
            out_specs=pl.BlockSpec((None, out_h, out_w, tb),
                                   lambda i: (i, 0, 0, 0)),
        ),
        compiler_params=pltpu.CompilerParams(
            dimension_semantics=("parallel",),
            vmem_limit_bytes=vmem_limit,
        ),
        cost_estimate=cost,
    )(phases)

    out = out_blocks.transpose(0, 3, 1, 2).reshape(NCp, out_h, out_w)
    return out[:NC].reshape(N, C, out_h, out_w)


def downsample_reference(x, kernel, factor=2):
    """Pure-XLA reference: depthwise strided cross-correlation with the flipped
    kernel == the conv2d(flip(k)) + ::factor sampling inside torch upfirdn2d."""
    k2d = make_kernel(kernel)
    kh, kw = k2d.shape
    p = kh - factor
    pad0, pad1 = (p + 1) // 2, p // 2
    N, C, H, W = x.shape
    kflip = jnp.asarray(np.ascontiguousarray(k2d[::-1, ::-1]), dtype=x.dtype)
    w = jnp.broadcast_to(kflip[None, None], (C, 1, kh, kw))
    return jax.lax.conv_general_dilated(
        x, w,
        window_strides=(factor, factor),
        padding=((pad0, pad1), (pad0, pad1)),
        dimension_numbers=("NCHW", "OIHW", "NCHW"),
        feature_group_count=C,
    )


if __name__ == "__main__":
    key = jax.random.PRNGKey(0)
    N, C, H, W = 2, 4, 16, 16
    x = jax.random.normal(key, (N, C, H, W), dtype=jnp.float32)

    # Standard StyleGAN2 blur kernel, factor-2 downsample (separable fast path).
    blur_kernel = [1, 3, 3, 1]
    y = downsample(x, blur_kernel, factor=2)
    jax.block_until_ready(y)
    ref = downsample_reference(x, blur_kernel, factor=2)
    assert y.shape == (N, C, H // 2, W // 2), y.shape
    assert jnp.allclose(y, ref, atol=1e-5, rtol=1e-5), float(jnp.max(jnp.abs(y - ref)))

    # Odd-sized 1-D kernel -> asymmetric pad (1, 0) path.
    y2 = downsample(x, [1.0, 2.0, 1.0], factor=2)
    jax.block_until_ready(y2)
    ref2 = downsample_reference(x, [1.0, 2.0, 1.0], factor=2)
    assert jnp.allclose(y2, ref2, atol=1e-5, rtol=1e-5), float(jnp.max(jnp.abs(y2 - ref2)))

    # Non-separable 2-D kernel -> generic direct-tap path.
    k2 = np.array([[1.0, 2.0, 1.0], [2.0, 8.0, 2.0], [1.0, 2.0, 1.0]], dtype=np.float32)
    y3 = downsample(x, k2, factor=2)
    jax.block_until_ready(y3)
    ref3 = downsample_reference(x, k2, factor=2)
    assert jnp.allclose(y3, ref3, atol=1e-5, rtol=1e-5), float(jnp.max(jnp.abs(y3 - ref3)))

    print("KERNEL_OK")
</pallas_src>

<mosaic_0001>
module attributes {stable_mosaic.version = 11 : i64} {
  func.func @_downsample_sep_kernel(%arg0: i32, %arg1: memref<1x4x9x9x8xf32, #tpu.memory_space<vmem>>, %arg2: memref<1x8x8x8xf32, #tpu.memory_space<vmem>>) attributes {dimension_semantics = [#tpu.dimension_semantics<parallel>], iteration_bounds = array<i64: 1>, scalar_prefetch = 0 : i64, scratch_operands = 0 : i64, tpu.core_type = #tpu.core_type<tc>, window_params = [{transform_indices = @transform_0, window_bounds = array<i64: 1, 4, 9, 9, 8>}, {transform_indices = @transform_1, window_bounds = array<i64: 1, 8, 8, 8>}]} {
    %cst = arith.constant 0.000000e+00 : f32
    %0 = vector.broadcast %cst : f32 to vector<8x8x8xf32>
    %cst_0 = arith.constant 0.000000e+00 : f32
    %1 = vector.broadcast %cst_0 : f32 to vector<8x8x8xf32>
    %cst_1 = arith.constant 0.000000e+00 : f32
    %2 = vector.broadcast %cst_1 : f32 to vector<8x9x8xf32>
    %cst_2 = arith.constant 0.000000e+00 : f32
    %3 = vector.broadcast %cst_2 : f32 to vector<8x9x8xf32>
    %c0 = arith.constant 0 : index
    %c0_3 = arith.constant 0 : index
    %c0_4 = arith.constant 0 : index
    %c0_5 = arith.constant 0 : index
    %c0_6 = arith.constant 0 : index
    %4 = vector.load %arg1[%c0, %c0_3, %c0_4, %c0_5, %c0_6] : memref<1x4x9x9x8xf32, #tpu.memory_space<vmem>>, vector<1x1x8x9x8xf32>
    %5 = vector.shape_cast %4 : vector<1x1x8x9x8xf32> to vector<8x9x8xf32>
    %cst_7 = arith.constant 1.250000e-01 : f32
    %6 = vector.broadcast %cst_7 : f32 to vector<8x9x8xf32>
    %7 = arith.mulf %6, %5 : vector<8x9x8xf32>
    %8 = arith.addf %2, %7 : vector<8x9x8xf32>
    %c0_8 = arith.constant 0 : index
    %c2 = arith.constant 2 : index
    %c0_9 = arith.constant 0 : index
    %c0_10 = arith.constant 0 : index
    %c0_11 = arith.constant 0 : index
    %9 = vector.load %arg1[%c0_8, %c2, %c0_9, %c0_10, %c0_11] : memref<1x4x9x9x8xf32, #tpu.memory_space<vmem>>, vector<1x1x8x9x8xf32>
    %10 = vector.shape_cast %9 : vector<1x1x8x9x8xf32> to vector<8x9x8xf32>
    %cst_12 = arith.constant 3.750000e-01 : f32
    %11 = vector.broadcast %cst_12 : f32 to vector<8x9x8xf32>
    %12 = arith.mulf %11, %10 : vector<8x9x8xf32>
    %13 = arith.addf %3, %12 : vector<8x9x8xf32>
    %c0_13 = arith.constant 0 : index
    %c0_14 = arith.constant 0 : index
    %c1 = arith.constant 1 : index
    %c0_15 = arith.constant 0 : index
    %c0_16 = arith.constant 0 : index
    %14 = vector.load %arg1[%c0_13, %c0_14, %c1, %c0_15, %c0_16] : memref<1x4x9x9x8xf32, #tpu.memory_space<vmem>>, vector<1x1x8x9x8xf32>
    %15 = vector.shape_cast %14 : vector<1x1x8x9x8xf32> to vector<8x9x8xf32>
    %cst_17 = arith.constant 3.750000e-01 : f32
    %16 = vector.broadcast %cst_17 : f32 to vector<8x9x8xf32>
    %17 = arith.mulf %16, %15 : vector<8x9x8xf32>
    %18 = arith.addf %8, %17 : vector<8x9x8xf32>
    %c0_18 = arith.constant 0 : index
    %c2_19 = arith.constant 2 : index
    %c1_20 = arith.constant 1 : index
    %c0_21 = arith.constant 0 : index
    %c0_22 = arith.constant 0 : index
    %19 = vector.load %arg1[%c0_18, %c2_19, %c1_20, %c0_21, %c0_22] : memref<1x4x9x9x8xf32, #tpu.memory_space<vmem>>, vector<1x1x8x9x8xf32>
    %20 = vector.shape_cast %19 : vector<1x1x8x9x8xf32> to vector<8x9x8xf32>
    %cst_23 = arith.constant 1.250000e-01 : f32
    %21 = vector.broadcast %cst_23 : f32 to vector<8x9x8xf32>
    %22 = arith.mulf %21, %20 : vector<8x9x8xf32>
    %23 = arith.addf %13, %22 : vector<8x9x8xf32>
    %24 = arith.addf %18, %23 : vector<8x9x8xf32>
    %25 = vector.extract_strided_slice %24 {offsets = [0, 0, 0], sizes = [8, 8, 8], strides = [1, 1, 1]} : vector<8x9x8xf32> to vector<8x8x8xf32>
    %cst_24 = arith.constant 1.250000e-01 : f32
    %26 = vector.broadcast %cst_24 : f32 to vector<8x8x8xf32>
    %27 = arith.mulf %26, %25 : vector<8x8x8xf32>
    %28 = arith.addf %0, %27 : vector<8x8x8xf32>
    %29 = vector.extract_strided_slice %24 {offsets = [0, 1, 0], sizes = [8, 8, 8], strides = [1, 1, 1]} : vector<8x9x8xf32> to vector<8x8x8xf32>
    %cst_25 = arith.constant 3.750000e-01 : f32
    %30 = vector.broadcast %cst_25 : f32 to vector<8x8x8xf32>
    %31 = arith.mulf %30, %29 : vector<8x8x8xf32>
    %32 = arith.addf %1, %31 : vector<8x8x8xf32>
    %cst_26 = arith.constant 0.000000e+00 : f32
    %33 = vector.broadcast %cst_26 : f32 to vector<8x9x8xf32>
    %cst_27 = arith.constant 0.000000e+00 : f32
    %34 = vector.broadcast %cst_27 : f32 to vector<8x9x8xf32>
    %c0_28 = arith.constant 0 : index
    %c1_29 = arith.constant 1 : index
    %c0_30 = arith.constant 0 : index
    %c0_31 = arith.constant 0 : index
    %c0_32 = arith.constant 0 : index
    %35 = vector.load %arg1[%c0_28, %c1_29, %c0_30, %c0_31, %c0_32] : memref<1x4x9x9x8xf32, #tpu.memory_space<vmem>>, vector<1x1x8x9x8xf32>
    %36 = vector.shape_cast %35 : vector<1x1x8x9x8xf32> to vector<8x9x8xf32>
    %cst_33 = arith.constant 1.250000e-01 : f32
    %37 = vector.broadcast %cst_33 : f32 to vector<8x9x8xf32>
    %38 = arith.mulf %37, %36 : vector<8x9x8xf32>
    %39 = arith.addf %33, %38 : vector<8x9x8xf32>
    %c0_34 = arith.constant 0 : index
    %c3 = arith.constant 3 : index
    %c0_35 = arith.constant 0 : index
    %c0_36 = arith.constant 0 : index
    %c0_37 = arith.constant 0 : index
    %40 = vector.load %arg1[%c0_34, %c3, %c0_35, %c0_36, %c0_37] : memref<1x4x9x9x8xf32, #tpu.memory_space<vmem>>, vector<1x1x8x9x8xf32>
    %41 = vector.shape_cast %40 : vector<1x1x8x9x8xf32> to vector<8x9x8xf32>
    %cst_38 = arith.constant 3.750000e-01 : f32
    %42 = vector.broadcast %cst_38 : f32 to vector<8x9x8xf32>
    %43 = arith.mulf %42, %41 : vector<8x9x8xf32>
    %44 = arith.addf %34, %43 : vector<8x9x8xf32>
    %c0_39 = arith.constant 0 : index
    %c1_40 = arith.constant 1 : index
    %c1_41 = arith.constant 1 : index
    %c0_42 = arith.constant 0 : index
    %c0_43 = arith.constant 0 : index
    %45 = vector.load %arg1[%c0_39, %c1_40, %c1_41, %c0_42, %c0_43] : memref<1x4x9x9x8xf32, #tpu.memory_space<vmem>>, vector<1x1x8x9x8xf32>
    %46 = vector.shape_cast %45 : vector<1x1x8x9x8xf32> to vector<8x9x8xf32>
    %cst_44 = arith.constant 3.750000e-01 : f32
    %47 = vector.broadcast %cst_44 : f32 to vector<8x9x8xf32>
    %48 = arith.mulf %47, %46 : vector<8x9x8xf32>
    %49 = arith.addf %39, %48 : vector<8x9x8xf32>
    %c0_45 = arith.constant 0 : index
    %c3_46 = arith.constant 3 : index
    %c1_47 = arith.constant 1 : index
    %c0_48 = arith.constant 0 : index
    %c0_49 = arith.constant 0 : index
    %50 = vector.load %arg1[%c0_45, %c3_46, %c1_47, %c0_48, %c0_49] : memref<1x4x9x9x8xf32, #tpu.memory_space<vmem>>, vector<1x1x8x9x8xf32>
    %51 = vector.shape_cast %50 : vector<1x1x8x9x8xf32> to vector<8x9x8xf32>
    %cst_50 = arith.constant 1.250000e-01 : f32
    %52 = vector.broadcast %cst_50 : f32 to vector<8x9x8xf32>
    %53 = arith.mulf %52, %51 : vector<8x9x8xf32>
    %54 = arith.addf %44, %53 : vector<8x9x8xf32>
    %55 = arith.addf %49, %54 : vector<8x9x8xf32>
    %56 = vector.extract_strided_slice %55 {offsets = [0, 0, 0], sizes = [8, 8, 8], strides = [1, 1, 1]} : vector<8x9x8xf32> to vector<8x8x8xf32>
    %cst_51 = arith.constant 3.750000e-01 : f32
    %57 = vector.broadcast %cst_51 : f32 to vector<8x8x8xf32>
    %58 = arith.mulf %57, %56 : vector<8x8x8xf32>
    %59 = arith.addf %28, %58 : vector<8x8x8xf32>
    %60 = vector.extract_strided_slice %55 {offsets = [0, 1, 0], sizes = [8, 8, 8], strides = [1, 1, 1]} : vector<8x9x8xf32> to vector<8x8x8xf32>
    %cst_52 = arith.constant 1.250000e-01 : f32
    %61 = vector.broadcast %cst_52 : f32 to vector<8x8x8xf32>
    %62 = arith.mulf %61, %60 : vector<8x8x8xf32>
    %63 = arith.addf %32, %62 : vector<8x8x8xf32>
    %64 = arith.addf %59, %63 : vector<8x8x8xf32>
    %c0_53 = arith.constant 0 : index
    %c0_54 = arith.constant 0 : index
    %c0_55 = arith.constant 0 : index
    %c0_56 = arith.constant 0 : index
    %65 = vector.load %arg2[%c0_53, %c0_54, %c0_55, %c0_56] : memref<1x8x8x8xf32, #tpu.memory_space<vmem>>, vector<1x8x8x8xf32>
    %66 = vector.shape_cast %65 : vector<1x8x8x8xf32> to vector<8x8x8xf32>
    %67 = vector.shape_cast %64 : vector<8x8x8xf32> to vector<1x8x8x8xf32>
    tpu.vector_store %arg2[%c0_53, %c0_54, %c0_55, %c0_56], %67 {strides = array<i32>} : memref<1x8x8x8xf32, #tpu.memory_space<vmem>>, vector<1x8x8x8xf32>,
    return
  }
  func.func @transform_0(%arg0: i32) -> (i32, i32, i32, i32, i32) {
    %c0_i32 = arith.constant 0 : i32
    %c0_i32_0 = arith.constant 0 : i32
    %c0_i32_1 = arith.constant 0 : i32
    %c0_i32_2 = arith.constant 0 : i32
    %c0_i32_3 = arith.constant 0 : i32
    return %arg0, %c0_i32, %c0_i32_0, %c0_i32_1, %c0_i32_2 : i32, i32, i32, i32, i32
  }
  func.func @transform_1(%arg0: i32) -> (i32, i32, i32, i32) {
    %c0_i32 = arith.constant 0 : i32
    %c0_i32_0 = arith.constant 0 : i32
    %c0_i32_1 = arith.constant 0 : i32
    %c0_i32_2 = arith.constant 0 : i32
    return %arg0, %c0_i32, %c0_i32_0, %c0_i32_1 : i32, i32, i32, i32
  }
}

</mosaic_0001>

<bundles_post_ra>
// kernel: tpu_custom_call.1
= control target key start
LH: loop header
LB: loop body
LE: loop exit
PB: predicated region body
PF: predicated region fallthrough
CT: control target
= control target key end

     0   :  { %vm544_vm0 = vcmask 1046528   ;;  %vm585_vm1 = vcmask 64512   ;;  %s1090_s0 = inlined_call_operand.vmem [shape: f32[1,4,9,9,8], index: 0, kind: input, shape index: {}]   ;;  %s1091_s1 = inlined_call_operand.hbm [shape: f32[1,8,8,8], index: 1, kind: output, shape index: {}]  }
   0x1   :  { %v9_v0 = vld [vmem:[%s1090_s0] sm:$0xff]  ;;  %v10_v1 = vld [vmem:[%s1090_s0 + $0x8] sm:$0x1]  ;;  %v626_v7 = vld [vmem:[%s1090_s0 + $0x10] sm:$0xff] }
   0x2   :  { %v610_v2 = vld [vmem:[%s1090_s0 + $0x120] sm:$0xff]  ;;  %v25_v3 = vmul.f32 0.125, %v9_v0  ;;  %v26_v4 = vmul.f32 0.125, %v10_v1  ;;  %v611_v5 = vld [vmem:[%s1090_s0 + $0x128] sm:$0x1]  ;;  %v123_v10 = vmul.f32 0.375, %v626_v7 }
   0x3   :  { %v74_v6 = vmul.f32 0.375, %v610_v2  ;;  %v75_v8 = vmul.f32 0.375, %v611_v5  ;;  %v627_v9 = vld [vmem:[%s1090_s0 + $0x18] sm:$0x1]  ;;  %v642_v11 = vld [vmem:[%s1090_s0 + $0x130] sm:$0xff]  ;;  %v690_v27 = vld [vmem:[%s1090_s0 + $0xa0] sm:$0xff] }
   0x4   :  { %v658_v12 = vld [vmem:[%s1090_s0 + $0x90] sm:$0xff]  ;;  %v124_v13 = vmul.f32 0.375, %v627_v9  ;;  %v643_v14 = vld [vmem:[%s1090_s0 + $0x138] sm:$0x1]  ;;  %v172_v15 = vmul.f32 0.125, %v642_v11  ;;  %v139_v17 = vadd.f32 %v123_v10, %v25_v3  ;;  %v706_v29 = vld [vmem:[%s1090_s0 + $0x1c0] sm:$0xff] }
   0x5   :  { %v659_v16 = vld [vmem:[%s1090_s0 + $0x98] sm:$0x1]  ;;  %v173_v18 = vmul.f32 0.125, %v643_v14  ;;  %v285_v19 = vmul.f32 0.125, %v658_v12  ;;  %v674_v21 = vld [vmem:[%s1090_s0 + $0x1b0] sm:$0xff]  ;;  %v383_v31 = vmul.f32 0.375, %v690_v27 }
   0x6   :  { %v286_v20 = vmul.f32 0.125, %v659_v16  ;;  %v675_v22 = vld [vmem:[%s1090_s0 + $0x1b8] sm:$0x1]  ;;  %v140_v23 = vadd.f32 %v124_v13, %v26_v4  ;;  %v188_v24 = vadd.f32 %v172_v15, %v74_v6  ;;  %v334_v25 = vmul.f32 0.375, %v674_v21  ;;  %v691_v28 = vld [vmem:[%s1090_s0 + $0xa8] sm:$0x1] }
   0x7   :  { %v335_v26 = vmul.f32 0.375, %v675_v22  ;;  %v189_v30 = vadd.f32 %v173_v18, %v75_v8  ;;  %v384_v32 = vmul.f32 0.375, %v691_v28  ;;  %v707_v33 = vld [vmem:[%s1090_s0 + $0x1c8] sm:$0x1]  ;;  %v432_v34 = vmul.f32 0.125, %v706_v29  ;;  %v628_v44 = vld [vmem:[%s1090_s0 + $0x20] sm:$0xff] }
   0x8   :  { %v204_v35 = vadd.f32 %v188_v24, %v139_v17  ;;  %v433_v36 = vmul.f32 0.125, %v707_v33  ;;  %v12_v37 = vld [vmem:[%s1090_s0 + $0x18] sm:$0x1]  ;;  %v27_v38 = vmul.f32 0.125, %v626_v7  ;;  %v399_v41 = vadd.f32 %v383_v31, %v285_v19  ;;  %v629_v45 = vld [vmem:[%s1090_s0 + $0x28] sm:$0x1] }
   0x9   :  { %v613_v39 = vld [vmem:[%s1090_s0 + $0x138] sm:$0x1]  ;;  %v205_v40 = vadd.f32 %v189_v30, %v140_v23  ;;  %v400_v42 = vadd.f32 %v384_v32, %v286_v20  ;;  %v448_v43 = vadd.f32 %v432_v34, %v334_v25  ;;  %v644_v46 = vld [vmem:[%s1090_s0 + $0x140] sm:$0xff]  ;;  %v28_v50 = vmul.f32 0.125, %v12_v37  ;;  %v645_v51 = vld [vmem:[%s1090_s0 + $0x148] sm:$0x1] }
   0xa   :  { %v220_v47 = vmul.f32 0.125, %v204_v35  ;;  %v236_v48 = vmul.f32 0.375, %v204_v35  ;;  %v449_v49 = vadd.f32 %v433_v36, %v335_v26  ;;  %v76_v54 = vmul.f32 0.375, %v642_v11  ;;  %v661_v60 = vld [vmem:[%s1090_s0 + $0xa8] sm:$0x1]  ;;  %v692_v6 = vld [vmem:[%s1090_s0 + $0xb0] sm:$0xff] }
   0xb   :  { %v237_v52 = vmul.f32 0.375, %v205_v40  ;;  %v464_v53 = vadd.f32 %v448_v43, %v399_v41  ;;  %v77_v55 = vmul.f32 0.375, %v613_v39  ;;  %v125_v57 = vmul.f32 0.375, %v628_v44  ;;  %v677_v1 = vld [vmem:[%s1090_s0 + $0x1c8] sm:$0x1]  ;;  %v708_v12 = vld [vmem:[%s1090_s0 + $0x1d0] sm:$0xff] }
   0xc   :  { %v465_v56 = vadd.f32 %v449_v49, %v400_v42  ;;  %v126_v58 = vmul.f32 0.375, %v629_v45  ;;  %v174_v59 = vmul.f32 0.125, %v644_v46  ;;  %v175_v63 = vmul.f32 0.125, %v645_v51  ;;  %v693_v7 = vld [vmem:[%s1090_s0 + $0xb8] sm:$0x1]  ;;  %v630_v32 = vld [vmem:[%s1090_s0 + $0x30] sm:$0xff] }
   0xd   :  { %v480_v61 = vmul.f32 0.375, %v464_v53  ;;  %v496_v62 = vmul.f32 0.125, %v464_v53  ;;  %v287_v0 = vmul.f32 0.125, %v690_v27  ;;  %v141_v3 = vadd.f32 %v125_v57, %v27_v38  ;;  %v709_v17 = vld [vmem:[%s1090_s0 + $0x1d8] sm:$0x1]  ;;  %v646_v34 = vld [vmem:[%s1090_s0 + $0x150] sm:$0xff] }
   0xe   :  { %v497_v2 = vmul.f32 0.125, %v465_v56  ;;  %v142_v4 = vadd.f32 %v126_v58, %v28_v50  ;;  %v190_v5 = vadd.f32 %v174_v59, %v76_v54  ;;  %v191_v10 = vadd.f32 %v175_v63, %v77_v55  ;;  %v14_v22 = vld [vmem:[%s1090_s0 + $0x28] sm:$0x1]  ;;  %v631_v33 = vld [vmem:[%s1090_s0 + $0x38] sm:$0x1]  ;;  %v694_v55 = vld [vmem:[%s1090_s0 + $0xc0] sm:$0xff] }
   0xf   :  { %v488_v8 = vadd.f32 %v480_v61, %v220_v47  ;;  %v512_v9 = vadd.f32 %v496_v62, %v236_v48  ;;  %v288_v11 = vmul.f32 0.125, %v661_v60  ;;  %v336_v15 = vmul.f32 0.375, %v706_v29  ;;  %v615_v27 = vld [vmem:[%s1090_s0 + $0x148] sm:$0x1]  ;;  %v647_v39 = vld [vmem:[%s1090_s0 + $0x158] sm:$0x1] }
  0x10   :  { %v513_v13 = vadd.f32 %v497_v2, %v237_v52  ;;  %v206_v14 = vadd.f32 %v190_v5, %v141_v3  ;;  %v337_v16 = vmul.f32 0.375, %v677_v1  ;;  %v207_v19 = vadd.f32 %v191_v10, %v142_v4  ;;  %v663_v40 = vld [vmem:[%s1090_s0 + $0xb8] sm:$0x1]  ;;  %v695_v59 = vld [vmem:[%s1090_s0 + $0xc8] sm:$0x1] }
  0x11   :  { %v545_v18 = vrot.slane %v512_v9, 1  ;;  %v385_v20 = vmul.f32 0.375, %v692_v6  ;;  %v386_v21 = vmul.f32 0.375, %v693_v7  ;;  %v434_v26 = vmul.f32 0.125, %v708_v12  ;;  %v679_v54 = vld [vmem:[%s1090_s0 + $0x1d8] sm:$0x1] }
  0x12   :  { %v546_v23 = vrot.slane %v513_v13, 1  ;;  %v221_v24 = vmul.f32 0.125, %v206_v14  ;;  %v238_v25 = vmul.f32 0.375, %v206_v14  ;;  %v239_v28 = vmul.f32 0.375, %v207_v19  ;;  %v711_v1 = vld [vmem:[%s1090_s0 + $0x1e8] sm:$0x1] }
  0x13   :  { %v401_v29 = vadd.f32 %v385_v20, %v287_v0  ;;  %v402_v30 = vadd.f32 %v386_v21, %v288_v11  ;;  %v435_v31 = vmul.f32 0.125, %v709_v17  ;;  %v450_v36 = vadd.f32 %v434_v26, %v336_v15  ;;  %v710_v0 = vld [vmem:[%s1090_s0 + $0x1e0] sm:$0xff]  ;;  %v16_v10 = vld [vmem:[%s1090_s0 + $0x38] sm:$0x1] }
  0x14   :  { %v547_v35 = vsel %vm544_vm0, %v545_v18, %v546_v23  ;;  %v29_v37 = vmul.f32 0.125, %v628_v44  ;;  %v30_v38 = vmul.f32 0.125, %v14_v22  ;;  %v78_v43 = vmul.f32 0.375, %v644_v46  ;;  %v617_v15 = vld [vmem:[%s1090_s0 + $0x158] sm:$0x1]  ;;  %v632_v20 = vld [vmem:[%s1090_s0 + $0x40] sm:$0xff] }
  0x15   :  { %v577_v41 = vadd.f32 %v547_v35, %v488_v8  ;;  %v451_v42 = vadd.f32 %v435_v31, %v337_v16  ;;  %v79_v45 = vmul.f32 0.375, %v615_v27  ;;  %v466_v47 = vadd.f32 %v450_v36, %v401_v29  ;;  %v648_v26 = vld [vmem:[%s1090_s0 + $0x160] sm:$0xff]  ;;  %v649_v27 = vld [vmem:[%s1090_s0 + $0x168] sm:$0x1] }
  0x16   :  { %v127_v48 = vmul.f32 0.375, %v630_v32  ;;  %v128_v49 = vmul.f32 0.375, %v631_v33  ;;  %v176_v50 = vmul.f32 0.125, %v646_v34  ;;  %v177_v51 = vmul.f32 0.125, %v647_v39 }
  0x17   :  { %586 = vst.msk [vmem:[#allocation2] sm:$0xff] %vm585_vm1, %v577_v41  ;;  %v467_v44 = vadd.f32 %v451_v42, %v402_v30  ;;  %v289_v52 = vmul.f32 0.125, %v692_v6  ;;  %v290_v53 = vmul.f32 0.125, %v663_v40  ;;  %v481_v46 = vmul.f32 0.375, %v466_v47 }
  0x18   :  { %v498_v56 = vmul.f32 0.125, %v466_v47  ;;  %v143_v57 = vadd.f32 %v127_v48, %v29_v37  ;;  %v144_v58 = vadd.f32 %v128_v49, %v30_v38  ;;  %v192_v61 = vadd.f32 %v176_v50, %v78_v43  ;;  %v665_v37 = vld [vmem:[%s1090_s0 + $0xc8] sm:$0x1]  ;;  %v696_v48 = vld [vmem:[%s1090_s0 + $0xd0] sm:$0xff] }
  0x19   :  { %v499_v60 = vmul.f32 0.125, %v467_v44  ;;  %v193_v62 = vadd.f32 %v177_v51, %v79_v45  ;;  %v338_v63 = vmul.f32 0.375, %v708_v12  ;;  %v489_v2 = vadd.f32 %v481_v46, %v221_v24 }
  0x1a   :  { %v514_v3 = vadd.f32 %v498_v56, %v238_v25  ;;  %v339_v4 = vmul.f32 0.375, %v679_v54  ;;  %v387_v5 = vmul.f32 0.375, %v694_v55  ;;  %v208_v7 = vadd.f32 %v192_v61, %v143_v57  ;;  %v633_v25 = vld [vmem:[%s1090_s0 + $0x48] sm:$0x1]  ;;  %v713_v61 = vld [vmem:[%s1090_s0 + $0x1f8] sm:$0x1] }
  0x1b   :  { %v515_v6 = vadd.f32 %v499_v60, %v239_v28  ;;  %v209_v8 = vadd.f32 %v193_v62, %v144_v58  ;;  %v388_v9 = vmul.f32 0.375, %v695_v59  ;;  %v436_v13 = vmul.f32 0.125, %v710_v0 }
  0x1c   :  { %v548_v11 = vrot.slane %v514_v3, 1  ;;  %v403_v12 = vadd.f32 %v387_v5, %v289_v52  ;;  %v437_v14 = vmul.f32 0.125, %v711_v1  ;;  %v222_v17 = vmul.f32 0.125, %v208_v7  ;;  %v697_v52 = vld [vmem:[%s1090_s0 + $0xd8] sm:$0x1] }
  0x1d   :  { %v549_v16 = vrot.slane %v515_v6, 1  ;;  %v240_v18 = vmul.f32 0.375, %v208_v7  ;;  %v241_v19 = vmul.f32 0.375, %v209_v8  ;;  %v404_v21 = vadd.f32 %v388_v9, %v290_v53  ;;  %v712_v53 = vld [vmem:[%s1090_s0 + $0x1f0] sm:$0xff]  ;;  %v18_v3 = vld [vmem:[%s1090_s0 + $0x48] sm:$0x1] }
  0x1e   :  { %v452_v22 = vadd.f32 %v436_v13, %v338_v63  ;;  %v453_v23 = vadd.f32 %v437_v14, %v339_v4  ;;  %v31_v24 = vmul.f32 0.125, %v630_v32  ;;  %v32_v29 = vmul.f32 0.125, %v16_v10  ;;  %v619_v7 = vld [vmem:[%s1090_s0 + $0x168] sm:$0x1]  ;;  %v634_v8 = vld [vmem:[%s1090_s0 + $0x50] sm:$0xff] }
  0x1f   :  { %v550_v28 = vsel %vm544_vm0, %v548_v11, %v549_v16  ;;  %v80_v30 = vmul.f32 0.375, %v646_v34  ;;  %v81_v31 = vmul.f32 0.375, %v617_v15  ;;  %v129_v36 = vmul.f32 0.375, %v632_v20  ;;  %v681_v34 = vld [vmem:[%s1090_s0 + $0x1e8] sm:$0x1]  ;;  %v650_v14 = vld [vmem:[%s1090_s0 + $0x170] sm:$0xff] }
  0x20   :  { %v578_v33 = vadd.f32 %v550_v28, %v489_v2  ;;  %v468_v35 = vadd.f32 %v452_v22, %v403_v12  ;;  %v469_v32 = vadd.f32 %v453_v23, %v404_v21  ;;  %v130_v38 = vmul.f32 0.375, %v633_v25  ;;  %v635_v13 = vld [vmem:[%s1090_s0 + $0x58] sm:$0x1] }
  0x21   :  { %v178_v39 = vmul.f32 0.125, %v648_v26  ;;  %v179_v40 = vmul.f32 0.125, %v649_v27  ;;  %v291_v41 = vmul.f32 0.125, %v694_v55  ;;  %v145_v47 = vadd.f32 %v129_v36, %v31_v24  ;;  %v651_v15 = vld [vmem:[%s1090_s0 + $0x178] sm:$0x1] }
  0x22   :  { %587 = vst.msk [vmem:[#allocation2 + $0x8] sm:$0xff] %vm585_vm1, %v578_v33  ;;  %v482_v42 = vmul.f32 0.375, %v468_v35  ;;  %v500_v43 = vmul.f32 0.125, %v468_v35  ;;  %v501_v45 = vmul.f32 0.125, %v469_v32  ;;  %v146_v49 = vadd.f32 %v130_v38, %v32_v29  ;;  %v667_v25 = vld [vmem:[%s1090_s0 + $0xd8] sm:$0x1] }
  0x23   :  { %v194_v50 = vadd.f32 %v178_v39, %v80_v30  ;;  %v195_v44 = vadd.f32 %v179_v40, %v81_v31  ;;  %v292_v51 = vmul.f32 0.125, %v665_v37  ;;  %v340_v56 = vmul.f32 0.375, %v710_v0  ;;  %v698_v32 = vld [vmem:[%s1090_s0 + $0xe0] sm:$0xff]  ;;  %v699_v40 = vld [vmem:[%s1090_s0 + $0xe8] sm:$0x1] }
  0x24   :  { %v490_v54 = vadd.f32 %v482_v42, %v222_v17  ;;  %v516_v55 = vadd.f32 %v500_v43, %v240_v18  ;;  %v517_v46 = vadd.f32 %v501_v45, %v241_v19  ;;  %v341_v59 = vmul.f32 0.375, %v681_v34 }
  0x25   :  { %v210_v57 = vadd.f32 %v194_v50, %v145_v47  ;;  %v211_v58 = vadd.f32 %v195_v44, %v146_v49  ;;  %v389_v60 = vmul.f32 0.375, %v696_v48  ;;  %v390_v1 = vmul.f32 0.375, %v697_v52 }
  0x26   :  { %v551_v62 = vrot.slane %v516_v55, 1  ;;  %v552_v63 = vrot.slane %v517_v46, 1  ;;  %v438_v2 = vmul.f32 0.125, %v712_v53  ;;  %v439_v11 = vmul.f32 0.125, %v713_v61 }
  0x27   :  { %v223_v4 = vmul.f32 0.125, %v210_v57  ;;  %v242_v5 = vmul.f32 0.375, %v210_v57  ;;  %v243_v6 = vmul.f32 0.375, %v211_v58  ;;  %v405_v0 = vadd.f32 %v389_v60, %v291_v41  ;;  %v714_v41 = vld [vmem:[%s1090_s0 + $0x200] sm:$0xff] }
  0x28   :  { %v553_v9 = vsel %vm544_vm0, %v551_v62, %v552_v63  ;;  %v406_v10 = vadd.f32 %v390_v1, %v292_v51  ;;  %v454_v12 = vadd.f32 %v438_v2, %v340_v56  ;;  %v33_v17 = vmul.f32 0.125, %v632_v20 }
  0x29   :  { %v579_v16 = vadd.f32 %v553_v9, %v490_v54  ;;  %v34_v18 = vmul.f32 0.125, %v18_v3  ;;  %v82_v19 = vmul.f32 0.375, %v648_v26  ;;  %v455_v21 = vadd.f32 %v439_v11, %v341_v59  ;;  %v683_v26 = vld [vmem:[%s1090_s0 + $0x1f8] sm:$0x1] }
  0x2a   :  { %v470_v22 = vadd.f32 %v454_v12, %v405_v0  ;;  %v83_v23 = vmul.f32 0.375, %v619_v7  ;;  %v131_v24 = vmul.f32 0.375, %v634_v8  ;;  %v132_v27 = vmul.f32 0.375, %v635_v13 }
  0x2b   :  { %588 = vst.msk [vmem:[#allocation2 + $0x10] sm:$0xff] %vm585_vm1, %v579_v16  ;;  %v180_v28 = vmul.f32 0.125, %v650_v14  ;;  %v181_v29 = vmul.f32 0.125, %v651_v15  ;;  %v293_v30 = vmul.f32 0.125, %v696_v48  ;;  %v471_v31 = vadd.f32 %v455_v21, %v406_v10 }
  0x2c   :  { %v483_v33 = vmul.f32 0.375, %v470_v22  ;;  %v502_v35 = vmul.f32 0.125, %v470_v22  ;;  %v147_v20 = vadd.f32 %v131_v24, %v33_v17  ;;  %v148_v36 = vadd.f32 %v132_v27, %v34_v18 }
  0x2d   :  { %v196_v37 = vadd.f32 %v180_v28, %v82_v19  ;;  %v197_v38 = vadd.f32 %v181_v29, %v83_v23  ;;  %v294_v39 = vmul.f32 0.125, %v667_v25  ;;  %v503_v43 = vmul.f32 0.125, %v471_v31 }
  0x2e   :  { %v491_v42 = vadd.f32 %v483_v33, %v223_v4  ;;  %v518_v45 = vadd.f32 %v502_v35, %v242_v5  ;;  %v342_v47 = vmul.f32 0.375, %v712_v53 }
  0x2f   :  { %6 = vsyncpa [#allocation3], 0  ;;  %v212_v34 = vadd.f32 %v196_v37, %v147_v20  ;;  %v213_v48 = vadd.f32 %v197_v38, %v148_v36  ;;  %v343_v49 = vmul.f32 0.375, %v683_v26  ;;  %v391_v50 = vmul.f32 0.375, %v698_v32  ;;  %v715_v44 = vld [vmem:[%s1090_s0 + $0x208] sm:$0x1] }
  0x30   :  { %v20_v51 = vld [vmem:[%s1090_s0 + $0x58] sm:$0x1]  ;;  %v519_v52 = vadd.f32 %v503_v43, %v243_v6  ;;  %v554_v54 = vrot.slane %v518_v45, 1  ;;  %v392_v55 = vmul.f32 0.375, %v699_v40  ;;  %v440_v46 = vmul.f32 0.125, %v714_v41  ;;  %v636_v60 = vld [vmem:[%s1090_s0 + $0x60] sm:$0xff] }
  0x31   :  { %v621_v53 = vld [vmem:[%s1090_s0 + $0x178] sm:$0x1]  ;;  %v224_v56 = vmul.f32 0.125, %v212_v34  ;;  %v244_v57 = vmul.f32 0.375, %v212_v34  ;;  %v245_v58 = vmul.f32 0.375, %v213_v48  ;;  %v407_v59 = vadd.f32 %v391_v50, %v293_v30  ;;  %v652_v3 = vld [vmem:[%s1090_s0 + $0x180] sm:$0xff] }
  0x32   :  { %v637_v61 = vld [vmem:[%s1090_s0 + $0x68] sm:$0x1]  ;;  %v555_v62 = vrot.slane %v519_v52, 1  ;;  %v408_v63 = vadd.f32 %v392_v55, %v294_v39  ;;  %v441_v1 = vmul.f32 0.125, %v715_v44  ;;  %v456_v2 = vadd.f32 %v440_v46, %v342_v47  ;;  %v700_v27 = vld [vmem:[%s1090_s0 + $0xf0] sm:$0xff] }
  0x33   :  { %v653_v4 = vld [vmem:[%s1090_s0 + $0x188] sm:$0x1]  ;;  %v35_v5 = vmul.f32 0.125, %v634_v8  ;;  %v36_v6 = vmul.f32 0.125, %v20_v51  ;;  %v84_v0 = vmul.f32 0.375, %v650_v14  ;;  %v85_v7 = vmul.f32 0.375, %v621_v53 }
  0x34   :  { %v556_v9 = vsel %vm544_vm0, %v554_v54, %v555_v62  ;;  %v457_v10 = vadd.f32 %v441_v1, %v343_v49  ;;  %v472_v11 = vadd.f32 %v456_v2, %v407_v59  ;;  %v133_v12 = vmul.f32 0.375, %v636_v60  ;;  %v669_v18 = vld [vmem:[%s1090_s0 + $0xe8] sm:$0x1]  ;;  %v701_v28 = vld [vmem:[%s1090_s0 + $0xf8] sm:$0x1]  ;;  %v716_v35 = vld [vmem:[%s1090_s0 + $0x210] sm:$0xff] }
  0x35   :  { %v580_v13 = vadd.f32 %v556_v9, %v491_v42  ;;  %v134_v15 = vmul.f32 0.375, %v637_v61  ;;  %v182_v16 = vmul.f32 0.125, %v652_v3  ;;  %v183_v17 = vmul.f32 0.125, %v653_v4  ;;  %v685_v14 = vld [vmem:[%s1090_s0 + $0x208] sm:$0x1]  ;;  %v638_v49 = vld [vmem:[%s1090_s0 + $0x70] sm:$0xff] }
  0x36   :  { %v473_v19 = vadd.f32 %v457_v10, %v408_v63  ;;  %v484_v21 = vmul.f32 0.375, %v472_v11  ;;  %v504_v22 = vmul.f32 0.125, %v472_v11  ;;  %v149_v8 = vadd.f32 %v133_v12, %v35_v5  ;;  %v717_v38 = vld [vmem:[%s1090_s0 + $0x218] sm:$0x1]  ;;  %v654_v55 = vld [vmem:[%s1090_s0 + $0x190] sm:$0xff] }
  0x37   :  { %589 = vst.msk [vmem:[#allocation2 + $0x18] sm:$0xff] %vm585_vm1, %v580_v13  ;;  %v150_v23 = vadd.f32 %v134_v15, %v36_v6  ;;  %v198_v24 = vadd.f32 %v182_v16, %v84_v0  ;;  %v199_v25 = vadd.f32 %v183_v17, %v85_v7  ;;  %v295_v31 = vmul.f32 0.125, %v698_v32  ;;  %v22_v32 = vld [vmem:[%s1090_s0 + $0x68] sm:$0x1]  ;;  %v639_v54 = vld [vmem:[%s1090_s0 + $0x78] sm:$0x1] }
  0x38   :  { %v505_v29 = vmul.f32 0.125, %v473_v19  ;;  %v520_v30 = vadd.f32 %v504_v22, %v244_v57  ;;  %v296_v33 = vmul.f32 0.125, %v669_v18  ;;  %v492_v20 = vadd.f32 %v484_v21, %v224_v56  ;;  %v671_v6 = vld [vmem:[%s1090_s0 + $0xf8] sm:$0x1]  ;;  %v702_v15 = vld [vmem:[%s1090_s0 + $0x100] sm:$0xff] }
  0x39   :  { %v214_v26 = vadd.f32 %v198_v24, %v149_v8  ;;  %v344_v36 = vmul.f32 0.375, %v714_v41  ;;  %v345_v37 = vmul.f32 0.375, %v685_v14  ;;  %v393_v42 = vmul.f32 0.375, %v700_v27  ;;  %v623_v41 = vld [vmem:[%s1090_s0 + $0x188] sm:$0x1]  ;;  %v718_v22 = vld [vmem:[%s1090_s0 + $0x220] sm:$0xff] }
  0x3a   :  { %v521_v39 = vadd.f32 %v505_v29, %v245_v58  ;;  %v557_v40 = vrot.slane %v520_v30, 1  ;;  %v394_v43 = vmul.f32 0.375, %v701_v28  ;;  %v215_v45 = vadd.f32 %v199_v25, %v150_v23  ;;  %v655_v58 = vld [vmem:[%s1090_s0 + $0x198] sm:$0x1]  ;;  %v703_v16 = vld [vmem:[%s1090_s0 + $0x108] sm:$0x1] }
  0x3b   :  { %v225_v47 = vmul.f32 0.125, %v214_v26  ;;  %v246_v34 = vmul.f32 0.375, %v214_v26  ;;  %v442_v48 = vmul.f32 0.125, %v716_v35  ;;  %v409_v44 = vadd.f32 %v393_v42, %v295_v31  ;;  %v687_v9 = vld [vmem:[%s1090_s0 + $0x218] sm:$0x1] }
  0x3c   :  { %v558_v50 = vrot.slane %v521_v39, 1  ;;  %v410_v51 = vadd.f32 %v394_v43, %v296_v33  ;;  %v443_v52 = vmul.f32 0.125, %v717_v38  ;;  %v37_v53 = vmul.f32 0.125, %v636_v60  ;;  %v719_v25 = vld [vmem:[%s1090_s0 + $0x228] sm:$0x1] }
  0x3d   :  { %v458_v46 = vadd.f32 %v442_v48, %v344_v36  ;;  %v38_v56 = vmul.f32 0.125, %v22_v32  ;;  %v86_v57 = vmul.f32 0.375, %v652_v3  ;;  %v87_v62 = vmul.f32 0.375, %v623_v41  ;;  %v641_v43 = vld [vmem:[%s1090_s0 + $0x88] sm:$0x1]  ;;  %v656_v48 = vld [vmem:[%s1090_s0 + $0x1a0] sm:$0xff] }
  0x3e   :  { %v559_v59 = vsel %vm544_vm0, %v557_v40, %v558_v50  ;;  %v459_v61 = vadd.f32 %v443_v52, %v345_v37  ;;  %v135_v63 = vmul.f32 0.375, %v638_v49  ;;  %v136_v4 = vmul.f32 0.375, %v639_v54  ;;  %v640_v37 = vld [vmem:[%s1090_s0 + $0x80] sm:$0xff]  ;;  %v657_v41 = vld [vmem:[%s1090_s0 + $0x1a8] sm:$0x1] }
  0x3f   :  { %v581_v1 = vadd.f32 %v559_v59, %v492_v20  ;;  %v474_v2 = vadd.f32 %v458_v46, %v409_v44  ;;  %v184_v5 = vmul.f32 0.125, %v654_v55  ;;  %v247_v60 = vmul.f32 0.375, %v215_v45 }
  0x40   :  { %v475_v0 = vadd.f32 %v459_v61, %v410_v51  ;;  %v151_v3 = vadd.f32 %v135_v63, %v37_v53  ;;  %v185_v7 = vmul.f32 0.125, %v655_v58  ;;  %v152_v12 = vadd.f32 %v136_v4, %v38_v56  ;;  %v704_v4 = vld [vmem:[%s1090_s0 + $0x110] sm:$0xff] }
  0x41   :  { %590 = vst.msk [vmem:[#allocation2 + $0x20] sm:$0xff] %vm585_vm1, %v581_v1  ;;  %v485_v10 = vmul.f32 0.375, %v474_v2  ;;  %v506_v11 = vmul.f32 0.125, %v474_v2  ;;  %v200_v13 = vadd.f32 %v184_v5, %v86_v57  ;;  %v297_v19 = vmul.f32 0.125, %v700_v27  ;;  %v24_v27 = vld [vmem:[%s1090_s0 + $0x78] sm:$0x1] }
  0x42   :  { %v507_v17 = vmul.f32 0.125, %v475_v0  ;;  %v201_v18 = vadd.f32 %v185_v7, %v87_v62  ;;  %v298_v21 = vmul.f32 0.125, %v671_v6  ;;  %v346_v24 = vmul.f32 0.375, %v716_v35  ;;  %v625_v35 = vld [vmem:[%s1090_s0 + $0x198] sm:$0x1]  ;;  %v720_v7 = vld [vmem:[%s1090_s0 + $0x230] sm:$0xff] }
  0x43   :  { %v493_v8 = vadd.f32 %v485_v10, %v225_v47  ;;  %v522_v14 = vadd.f32 %v506_v11, %v246_v34  ;;  %v216_v23 = vadd.f32 %v200_v13, %v151_v3  ;;  %v347_v29 = vmul.f32 0.375, %v687_v9  ;;  %v689_v62 = vld [vmem:[%s1090_s0 + $0x228] sm:$0x1]  ;;  %v705_v5 = vld [vmem:[%s1090_s0 + $0x118] sm:$0x1] }
  0x44   :  { %v523_v28 = vadd.f32 %v507_v17, %v247_v60  ;;  %v395_v30 = vmul.f32 0.375, %v702_v15  ;;  %v396_v31 = vmul.f32 0.375, %v703_v16  ;;  %v217_v20 = vadd.f32 %v201_v18, %v152_v12  ;;  %v721_v9 = vld [vmem:[%s1090_s0 + $0x238] sm:$0x1] }
  0x45   :  { %v560_v33 = vrot.slane %v522_v14, 1  ;;  %v226_v26 = vmul.f32 0.125, %v216_v23  ;;  %v444_v36 = vmul.f32 0.125, %v718_v22  ;;  %v248_v39 = vmul.f32 0.375, %v216_v23 }
  0x46   :  { %v561_v38 = vrot.slane %v523_v28, 1  ;;  %v411_v40 = vadd.f32 %v395_v30, %v297_v19  ;;  %v412_v42 = vadd.f32 %v396_v31, %v298_v21  ;;  %v445_v32 = vmul.f32 0.125, %v719_v25 }
  0x47   :  { %v460_v45 = vadd.f32 %v444_v36, %v346_v24  ;;  %v39_v47 = vmul.f32 0.125, %v638_v49  ;;  %v40_v34 = vmul.f32 0.125, %v24_v27  ;;  %v88_v44 = vmul.f32 0.375, %v654_v55  ;;  %v673_v49 = vld [vmem:[%s1090_s0 + $0x108] sm:$0x1]  ;;  %s749_s0 = smov [#allocation2]  }
  0x48   :  { %v562_v50 = vsel %vm544_vm0, %v560_v33, %v561_v38  ;;  %v89_v51 = vmul.f32 0.375, %v625_v35  ;;  %v137_v52 = vmul.f32 0.375, %v640_v37  ;;  %v461_v46 = vadd.f32 %v445_v32, %v347_v29  ;;  %s599_s3 = sshll.u32 %s749_s0, 4  ;;  %s600_s3 = int_to_ptr.vmem [resolvable:$true] %s599_s3 }
  0x49   :  { %v582_v54 = vadd.f32 %v562_v50, %v493_v8  ;;  %v476_v53 = vadd.f32 %v460_v45, %v411_v40  ;;  %v138_v56 = vmul.f32 0.375, %v641_v43  ;;  %v249_v57 = vmul.f32 0.375, %v217_v20  ;;  %s725_s4 = scalar_lea.vmem %s600_s3, 1024  ;;  %p730_p1 = scmp.lt.s32.totalorder %s600_s3, %s600_s3 }
  0x4a   :  { %v153_v58 = vadd.f32 %v137_v52, %v39_v47  ;;  %v186_v59 = vmul.f32 0.125, %v656_v48  ;;  %v187_v61 = vmul.f32 0.125, %v657_v41  ;;  %v477_v55 = vadd.f32 %v461_v46, %v412_v42  ;;  %p726_p0 = scmp.ne.s32.totalorder %s600_s3, %s725_s4  ;;  %p731_p2 = scmp.lt.s32.totalorder %s725_s4, %s725_s4 }
  0x4b   :  { %591 = vst.msk [vmem:[#allocation2 + $0x28] sm:$0xff] %vm585_vm1, %v582_v54  ;;  %v508_v63 = vmul.f32 0.125, %v476_v53  ;;  %v154_v1 = vadd.f32 %v138_v56, %v40_v34  ;;  %v299_v2 = vmul.f32 0.125, %v702_v15  ;;  %v486_v6 = vmul.f32 0.375, %v476_v53 }
  0x4c   :  { %v202_v60 = vadd.f32 %v186_v59, %v88_v44  ;;  %v203_v0 = vadd.f32 %v187_v61, %v89_v51  ;;  %v300_v3 = vmul.f32 0.125, %v673_v49  ;;  %v509_v10 = vmul.f32 0.125, %v477_v55  ;;  %p732_p3 = por %p731_p2, %p730_p1 }
  0x4d   :  { %v524_v11 = vadd.f32 %v508_v63, %v248_v39  ;;  %v348_v12 = vmul.f32 0.375, %v718_v22  ;;  %v349_v13 = vmul.f32 0.375, %v689_v62  ;;  %v397_v17 = vmul.f32 0.375, %v704_v4 }
  0x4e   :  { %v218_v15 = vadd.f32 %v202_v60, %v153_v58  ;;  %v219_v16 = vadd.f32 %v203_v0, %v154_v1  ;;  %v398_v18 = vmul.f32 0.375, %v705_v5  ;;  %v525_v19 = vadd.f32 %v509_v10, %v249_v57  ;;  %p733_p4 = pnand %p732_p3, %p726_p0 }
  0x4f   :  { %v563_v21 = vrot.slane %v524_v11, 1  ;;  %v446_v8 = vmul.f32 0.125, %v720_v7  ;;  %v447_v14 = vmul.f32 0.125, %v721_v9  ;;  %v494_v23 = vadd.f32 %v486_v6, %v226_v26 }
  0x50   :  { %v413_v24 = vadd.f32 %v397_v17, %v299_v2  ;;  %v564_v25 = vrot.slane %v525_v19, 1  ;;  %v414_v28 = vadd.f32 %v398_v18, %v300_v3  ;;  %v250_v31 = vmul.f32 0.375, %v218_v15 }
  0x51   :  { %v462_v29 = vadd.f32 %v446_v8, %v348_v12  ;;  %v463_v30 = vadd.f32 %v447_v14, %v349_v13  ;;  %v251_v33 = vmul.f32 0.375, %v219_v16  ;;  %v227_v35 = vmul.f32 0.125, %v218_v15 }
  0x52   :  { %v565_v27 = vsel %vm544_vm0, %v563_v21, %v564_v25 }
  0x53   :  { %v478_v22 = vadd.f32 %v462_v29, %v413_v24  ;;  %v479_v20 = vadd.f32 %v463_v30, %v414_v28  ;;  %v583_v36 = vadd.f32 %v565_v27, %v494_v23 }
  0x55   :  { %v487_v37 = vmul.f32 0.375, %v478_v22  ;;  %v510_v38 = vmul.f32 0.125, %v478_v22  ;;  %v511_v39 = vmul.f32 0.125, %v479_v20  ;;  %592 = vst.msk [vmem:[#allocation2 + $0x30] sm:$0xff] %vm585_vm1, %v583_v36 }
  0x57   :  { %v526_v40 = vadd.f32 %v510_v38, %v250_v31  ;;  %v527_v26 = vadd.f32 %v511_v39, %v251_v33  ;;  %v495_v42 = vadd.f32 %v487_v37, %v227_v35 }
  0x59   :  { %v566_v43 = vrot.slane %v526_v40, 1  ;;  %v567_v32 = vrot.slane %v527_v26, 1 }
  0x5b   :  { %v568_v45 = vsel %vm544_vm0, %v566_v43, %v567_v32 }
  0x5c   :  { %v584_v47 = vadd.f32 %v568_v45, %v495_v42 }
  0x5e   :  { %593 = vst.msk [vmem:[#allocation2 + $0x38] sm:$0xff] %vm585_vm1, %v584_v47 }
  0x5f   :  { %736 = shalt.err (!%p733_p4)
}
  0x60   :  { %s737_s7 = scalar_lea.hbm %s1091_s1, 1024 }
  0x61   :  { %p738_p5 = scmp.ne.s32.totalorder %s1091_s1, %s737_s7  ;;  %p741_p6 = scmp.lt.u32.totalorder %s737_s7, %s1091_s1 }
  0x63   :  { %p743_p7 = pnand %p741_p6, %p738_p5 }
  0x65   :  { %746 = shalt.err (!%p743_p7)
}
  0x66   :  { %s750_s12 = smov 128   ;;  %s751_s13 = smov 8  }
  0x67   :  { %605 = dma.vmem_to_hbm [thread:$0]  %s600_s3, 1024, %s1091_s1, [#allocation3], %s750_s12, %s750_s12, %s751_s13  }
  0x68   :  { %747 = dma.done.wait [#allocation3], 1024  }
  0x69   :  { %748 = vsyncadd [#allocation3], 4294966272 }
  0x6a   :  { %609 = vsyncpa [#allocation3], 1 }

</bundles_post_ra>
